<compile_context>
chip_gen: v7x
topology: tpu7x:2x2x1
jax: 0.10.0
libtpu: 0.0.40
codegen_flags: <defaults>
</compile_context>

<pallas_src>
import functools

import jax
import jax.numpy as jnp
import numpy as np
from jax import lax
from jax.experimental import pallas as pl
from jax.experimental.pallas import tpu as pltpu


def _round_up(a, b):
    return (a + b - 1) // b * b


def _pad_to(a, shape):
    if tuple(a.shape) == tuple(shape):
        return a
    return jnp.zeros(shape, a.dtype).at[tuple(slice(0, s) for s in a.shape)].set(a)


# ----------------------------------------------------------------------------
# Fused kernel: bf16 (q @ W^T) accumulated in the f32 output block,
# + per-tensor scale + LoRA epilogue + bias at the last k step.
# ----------------------------------------------------------------------------
def _lora_linear_kernel(s_ref, q_ref, w_ref, d_ref, bt_ref, bias_ref, o_ref):
    k = pl.program_id(2)

    @pl.when(k == 0)
    def _():
        o_ref[...] = jnp.zeros_like(o_ref)

    # q: (tm, tk) bf16 integers; w: (tn, tk) bf16 (native (N, K) layout).
    # Contract the last dims of both -> (tm, tn), f32 accumulation on the MXU.
    o_ref[...] += lax.dot_general(
        q_ref[...], w_ref[...],
        dimension_numbers=(((1,), (1,)), ((), ())),
        preferred_element_type=jnp.float32)

    @pl.when(k == pl.num_programs(2) - 1)
    def _():
        scale = s_ref[0]
        y = scale * o_ref[...]
        # LoRA residual epilogue: (tm, 128) @ (128, tn), kept in f32.
        y = y + jnp.dot(d_ref[...], bt_ref[...],
                        preferred_element_type=jnp.float32)
        o_ref[...] = y + bias_ref[...]


def lora_cliping_linear(x, weight, bias, B, outlier_idx, nbits=8,
                        tm=512, tn=2048, tk=1024):
    """x: (..., K); weight: (N, K); bias: (1, N); B: (N, n_outlier)."""
    K = x.shape[-1]
    N = weight.shape[0]
    lead = x.shape[:-1]
    x2d = x.reshape(-1, K).astype(jnp.float32)
    M = x2d.shape[0]
    n_out = len(outlier_idx)

    # ---- pass 1 (XLA, memory-bound): clipping threshold + per-tensor scale ----
    if n_out > 0:
        oi = jnp.asarray(outlier_idx, jnp.int32)
        mask = jnp.ones((K,), jnp.float32).at[oi].set(0.0)
    else:
        mask = jnp.ones((K,), jnp.float32)
    upper = jnp.max(jnp.abs(x2d) * mask)                 # max |x| over normal cols
    q_max = float(2 ** (nbits - 1) - 1)
    scale = jnp.maximum(upper, 1e-5) / q_max             # max|x_clip| == upper
    inv_scale = 1.0 / scale

    # ---- pass 2 (XLA, memory-bound): pre-quantize x to a bf16 integer stream ----
    # clip/round in f32 (matches reference bucketing), then cast: the values are
    # integers in [-127, 127] and therefore exact in bf16.
    x_clip = jnp.clip(x2d, -upper, upper)
    q_bf16 = jnp.round(x_clip * inv_scale).astype(jnp.bfloat16)

    # ---- LoRA operands: gather the few outlier columns, pad lanes to 128 ----
    NO = 128                                             # outlier lane padding
    if n_out > 0:
        x_o = x2d[:, oi]                                 # (M, n_out)
        d_o = x_o - jnp.clip(x_o, -upper, upper)         # == (x - x_clip)[..., outlier]
        b_t = B.astype(jnp.float32).T                    # (n_out, N)
    else:
        d_o = jnp.zeros((M, 1), jnp.float32)
        b_t = jnp.zeros((1, N), jnp.float32)

    # ---- tiling: clamp to problem size, pad arrays to tile multiples ----
    tm = min(tm, _round_up(M, 8))
    tn = min(tn, _round_up(N, 128))
    tk = min(tk, _round_up(K, 128))
    # If the i axis has a single block (small M / decode), split the j axis so
    # both v7x TensorCores (sharded over the parallel grid axes) get work.
    Np_full = _round_up(N, 128)
    if _round_up(M, 8) <= tm and Np_full >= 2 * 128:
        tn = min(tn, max(128, (Np_full // 2) // 128 * 128))
    Mp, Np, Kp = _round_up(M, tm), _round_up(N, tn), _round_up(K, tk)

    q_p = _pad_to(q_bf16, (Mp, Kp))                                  # bf16 activations
    w_bf16 = weight if weight.dtype == jnp.bfloat16 else weight.astype(jnp.bfloat16)
    w_p = _pad_to(w_bf16, (Np, Kp))                                  # native (N, K) layout
    d_p = _pad_to(d_o, (Mp, NO))
    bt_p = _pad_to(b_t, (NO, Np))
    bias_p = _pad_to(bias.astype(jnp.float32).reshape(1, N), (1, Np))
    scalars = jnp.reshape(scale, (1,)).astype(jnp.float32)

    grid = (Mp // tm, Np // tn, Kp // tk)

    # True double-buffered VMEM footprint + 25% headroom, clamped to a window
    # that is above every generation's default scoped limit (v5e: 16 MiB) and
    # safely under v7x's 64 MiB physical VMEM.
    vmem_bytes = (2 * tm * tk * 2 +      # q (bf16)
                  2 * tn * tk * 2 +      # W (bf16)
                  2 * tm * NO * 4 +      # outlier delta (f32)
                  2 * NO * tn * 4 +      # padded B^T (f32)
                  2 * 8 * tn * 4 +       # bias (padded to 8 sublanes)
                  2 * tm * tn * 4)       # f32 output block / accumulator
    vmem_limit = int(min(max(int(vmem_bytes * 1.25), 32 << 20), 40 << 20))

    out_p = pl.pallas_call(
        _lora_linear_kernel,
        out_shape=jax.ShapeDtypeStruct((Mp, Np), jnp.float32),
        grid_spec=pltpu.PrefetchScalarGridSpec(
            num_scalar_prefetch=0,
            grid=grid,
            in_specs=[
                pl.BlockSpec(memory_space=pltpu.MemorySpace.SMEM),   # [scale]
                pl.BlockSpec((tm, tk), lambda i, j, k: (i, k)),      # q (bf16)
                pl.BlockSpec((tn, tk), lambda i, j, k: (j, k)),      # W (bf16, (N,K))
                pl.BlockSpec((tm, NO), lambda i, j, k: (i, 0)),      # outlier delta (f32)
                pl.BlockSpec((NO, tn), lambda i, j, k: (0, j)),      # padded B^T (f32)
                pl.BlockSpec((1, tn), lambda i, j, k: (0, j)),       # bias
            ],
            out_specs=pl.BlockSpec((tm, tn), lambda i, j, k: (i, j)),
        ),
        compiler_params=pltpu.CompilerParams(
            dimension_semantics=("parallel", "parallel", "arbitrary"),
            vmem_limit_bytes=vmem_limit),
    )(scalars, q_p, w_p, d_p, bt_p, bias_p)

    return out_p[:M, :N].reshape(*lead, N)


# ----------------------------------------------------------------------------
# Pure-JAX reference (mirrors the PyTorch forward; weight applied in bf16 to
# match the kernel's MXU dtype policy — the module itself stores fp16 weights).
# The reciprocal-multiply form of the fake quant matches the kernel.
# ----------------------------------------------------------------------------
def ref_forward(x, weight, bias, B, outlier_idx, nbits=8):
    K = x.shape[-1]
    x = x.astype(jnp.float32)
    if len(outlier_idx) > 0:
        oi = jnp.asarray(outlier_idx, jnp.int32)
        mask = jnp.ones((K,), jnp.float32).at[oi].set(0.0)
        upper = jnp.max(jnp.abs(x) * mask)
        x_clip = jnp.clip(x, -upper, upper)
        x_outlier = (x - x_clip)[..., oi]
        y_res = x_outlier @ B.astype(jnp.float32).T
    else:
        x_clip = x
        y_res = 0.0
    q_max = 2 ** (nbits - 1) - 1
    scales = jnp.maximum(jnp.max(jnp.abs(x_clip)), 1e-5) / q_max
    q_x = jnp.round(x_clip * (1.0 / scales)) * scales
    w = weight.astype(jnp.bfloat16).astype(jnp.float32)
    y = q_x @ w.T + bias.astype(jnp.float32)
    return y + y_res  # Qo is identity (quantize_output=False)


if __name__ == "__main__":
    key = jax.random.PRNGKey(0)
    k_x, k_w, k_b, k_bias = jax.random.split(key, 4)

    batch, seq = 2, 8
    in_features, out_features = 256, 128
    outlier_idx = (3, 100, 200)
    nbits = 8

    x = jax.random.normal(k_x, (batch, seq, in_features), jnp.float32) * 2.0
    # Boost the outlier columns so they exceed the clip threshold and the
    # LoRA residual path is actually exercised.
    x = x.at[..., jnp.asarray(outlier_idx)].multiply(8.0)
    weight = jax.random.normal(k_w, (out_features, in_features), jnp.float32)
    B = jax.random.normal(k_b, (out_features, len(outlier_idx)), jnp.float32) * 0.1
    bias = jax.random.normal(k_bias, (1, out_features), jnp.float32) * 0.05

    fwd = jax.jit(functools.partial(lora_cliping_linear,
                                    outlier_idx=outlier_idx, nbits=nbits))
    out = fwd(x, weight, bias, B)
    out = jax.block_until_ready(out)

    ref = ref_forward(x, weight, bias, B, outlier_idx, nbits=nbits)
    np.testing.assert_allclose(np.asarray(out), np.asarray(ref),
                               rtol=1e-3, atol=1e-3)
    print("KERNEL_OK")
</pallas_src>

<mosaic_0001>
module attributes {stable_mosaic.version = 11 : i64} {
  func.func @_lora_linear_kernel(%arg0: i32, %arg1: i32, %arg2: i32, %arg3: memref<1xf32, #tpu.memory_space<smem>>, %arg4: memref<16x256xbf16, #tpu.memory_space<vmem>>, %arg5: memref<128x256xbf16, #tpu.memory_space<vmem>>, %arg6: memref<16x128xf32, #tpu.memory_space<vmem>>, %arg7: memref<128x128xf32, #tpu.memory_space<vmem>>, %arg8: memref<1x128xf32, #tpu.memory_space<vmem>>, %arg9: memref<16x128xf32, #tpu.memory_space<vmem>>) attributes {dimension_semantics = [#tpu.dimension_semantics<parallel>, #tpu.dimension_semantics<parallel>, #tpu.dimension_semantics<arbitrary>], iteration_bounds = array<i64: 1, 1, 1>, scalar_prefetch = 0 : i64, scratch_operands = 0 : i64, tpu.core_type = #tpu.core_type<tc>, window_params = [{transform_indices = @transform_0, window_bounds = array<i64: 1>}, {transform_indices = @transform_1, window_bounds = array<i64: 16, 256>}, {transform_indices = @transform_2, window_bounds = array<i64: 128, 256>}, {transform_indices = @transform_3, window_bounds = array<i64: 16, 128>}, {transform_indices = @transform_4, window_bounds = array<i64: 128, 128>}, {transform_indices = @transform_5, window_bounds = array<i64: 1, 128>}, {transform_indices = @transform_6, window_bounds = array<i64: 16, 128>}]} {
    %c0_i32 = arith.constant 0 : i32
    %0 = arith.cmpi eq, %arg2, %c0_i32 : i32
    %1 = arith.extui %0 : i1 to i32
    %c0_i32_0 = arith.constant 0 : i32
    %2 = arith.cmpi ne, %1, %c0_i32_0 : i32
    scf.if %2 {
      %cst_10 = arith.constant 0.000000e+00 : f32
      %12 = vector.broadcast %cst_10 : f32 to vector<16x128xf32>
      %c0_11 = arith.constant 0 : index
      %c0_12 = arith.constant 0 : index
      %13 = vector.load %arg9[%c0_11, %c0_12] : memref<16x128xf32, #tpu.memory_space<vmem>>, vector<16x128xf32>
      tpu.vector_store %arg9[%c0_11, %c0_12], %12 {strides = array<i32>} : memref<16x128xf32, #tpu.memory_space<vmem>>, vector<16x128xf32>,
    } else {
    }
    %c0 = arith.constant 0 : index
    %c0_1 = arith.constant 0 : index
    %3 = vector.load %arg9[%c0, %c0_1] : memref<16x128xf32, #tpu.memory_space<vmem>>, vector<16x128xf32>
    %c0_2 = arith.constant 0 : index
    %c0_3 = arith.constant 0 : index
    %4 = vector.load %arg4[%c0_2, %c0_3] : memref<16x256xbf16, #tpu.memory_space<vmem>>, vector<16x256xbf16>
    %c0_4 = arith.constant 0 : index
    %c0_5 = arith.constant 0 : index
    %5 = vector.load %arg5[%c0_4, %c0_5] : memref<128x256xbf16, #tpu.memory_space<vmem>>, vector<128x256xbf16>
    %cst = arith.constant dense<0.000000e+00> : vector<16x128xf32>
    %6 = tpu.matmul %4, %5, %cst {dimension_numbers = #tpu.dot_dimension_numbers<[1], [1], [0], [0], [0, 0, 1, 0], [], []>} : vector<16x256xbf16>, vector<128x256xbf16>, vector<16x128xf32> -> vector<16x128xf32>
    %7 = arith.addf %3, %6 : vector<16x128xf32>
    %c0_6 = arith.constant 0 : index
    %c0_7 = arith.constant 0 : index
    %8 = vector.load %arg9[%c0_6, %c0_7] : memref<16x128xf32, #tpu.memory_space<vmem>>, vector<16x128xf32>
    tpu.vector_store %arg9[%c0_6, %c0_7], %7 {strides = array<i32>} : memref<16x128xf32, #tpu.memory_space<vmem>>, vector<16x128xf32>,
    %c0_i32_8 = arith.constant 0 : i32
    %9 = arith.cmpi eq, %arg2, %c0_i32_8 : i32
    %10 = arith.extui %9 : i1 to i32
    %c0_i32_9 = arith.constant 0 : i32
    %11 = arith.cmpi ne, %10, %c0_i32_9 : i32
    scf.if %11 {
      %c0_10 = arith.constant 0 : index
      %12 = memref.load %arg3[%c0_10] : memref<1xf32, #tpu.memory_space<smem>>
      %c0_11 = arith.constant 0 : index
      %c0_12 = arith.constant 0 : index
      %13 = vector.load %arg9[%c0_11, %c0_12] : memref<16x128xf32, #tpu.memory_space<vmem>>, vector<16x128xf32>
      %14 = vector.broadcast %12 : f32 to vector<16x128xf32>
      %15 = arith.mulf %14, %13 : vector<16x128xf32>
      %c0_13 = arith.constant 0 : index
      %c0_14 = arith.constant 0 : index
      %16 = vector.load %arg6[%c0_13, %c0_14] : memref<16x128xf32, #tpu.memory_space<vmem>>, vector<16x128xf32>
      %c0_15 = arith.constant 0 : index
      %c0_16 = arith.constant 0 : index
      %17 = vector.load %arg7[%c0_15, %c0_16] : memref<128x128xf32, #tpu.memory_space<vmem>>, vector<128x128xf32>
      %cst_17 = arith.constant dense<0.000000e+00> : vector<16x128xf32>
      %18 = tpu.matmul %16, %17, %cst_17 {dimension_numbers = #tpu.dot_dimension_numbers<[1], [0], [0], [1], [0, 0, 1, 1], [], []>} : vector<16x128xf32>, vector<128x128xf32>, vector<16x128xf32> -> vector<16x128xf32>
      %19 = arith.addf %15, %18 : vector<16x128xf32>
      %c0_18 = arith.constant 0 : index
      %c0_19 = arith.constant 0 : index
      %20 = vector.load %arg8[%c0_18, %c0_19] : memref<1x128xf32, #tpu.memory_space<vmem>>, vector<1x128xf32>
      %21 = vector.broadcast %20 : vector<1x128xf32> to vector<16x128xf32>
      %22 = arith.addf %19, %21 : vector<16x128xf32>
      %c0_20 = arith.constant 0 : index
      %c0_21 = arith.constant 0 : index
      %23 = vector.load %arg9[%c0_20, %c0_21] : memref<16x128xf32, #tpu.memory_space<vmem>>, vector<16x128xf32>
      tpu.vector_store %arg9[%c0_20, %c0_21], %22 {strides = array<i32>} : memref<16x128xf32, #tpu.memory_space<vmem>>, vector<16x128xf32>,
    } else {
    }
    return
  }
  func.func @transform_0(%arg0: i32, %arg1: i32, %arg2: i32) -> i32 {
    %c0_i32 = arith.constant 0 : i32
    %c0_i32_0 = arith.constant 0 : i32
    return %c0_i32 : i32
  }
  func.func @transform_1(%arg0: i32, %arg1: i32, %arg2: i32) -> (i32, i32) {
    %c0_i32 = arith.constant 0 : i32
    return %arg0, %arg2 : i32, i32
  }
  func.func @transform_2(%arg0: i32, %arg1: i32, %arg2: i32) -> (i32, i32) {
    %c0_i32 = arith.constant 0 : i32
    return %arg1, %arg2 : i32, i32
  }
  func.func @transform_3(%arg0: i32, %arg1: i32, %arg2: i32) -> (i32, i32) {
    %c0_i32 = arith.constant 0 : i32
    %c0_i32_0 = arith.constant 0 : i32
    return %arg0, %c0_i32 : i32, i32
  }
  func.func @transform_4(%arg0: i32, %arg1: i32, %arg2: i32) -> (i32, i32) {
    %c0_i32 = arith.constant 0 : i32
    %c0_i32_0 = arith.constant 0 : i32
    return %c0_i32, %arg1 : i32, i32
  }
  func.func @transform_5(%arg0: i32, %arg1: i32, %arg2: i32) -> (i32, i32) {
    %c0_i32 = arith.constant 0 : i32
    %c0_i32_0 = arith.constant 0 : i32
    return %c0_i32, %arg1 : i32, i32
  }
  func.func @transform_6(%arg0: i32, %arg1: i32, %arg2: i32) -> (i32, i32) {
    %c0_i32 = arith.constant 0 : i32
    return %arg0, %arg1 : i32, i32
  }
}

</mosaic_0001>

<bundles_post_ra>
// kernel: lora_cliping_linear.1
= control target key start
LH: loop header
LB: loop body
LE: loop exit
PB: predicated region body
PF: predicated region fallthrough
CT: control target
= control target key end

     0   :  { %s641_s0 = inlined_call_operand.<no memory space> [shape: f32[1], index: 0, kind: input, shape index: {}]   ;;  %s642_s1 = inlined_call_operand.vmem [shape: bf16[16,256], index: 1, kind: input, shape index: {}]   ;;  %s643_s2 = inlined_call_operand.vmem [shape: bf16[128,256], index: 2, kind: input, shape index: {}]   ;;  %s644_s3 = inlined_call_operand.vmem [shape: f32[16,128], index: 3, kind: input, shape index: {}]   ;;  %s645_s4 = inlined_call_operand.vmem [shape: f32[128,128], index: 4, kind: input, shape index: {}]   ;;  %s646_s5 = inlined_call_operand.vmem [shape: f32[1,128], index: 5, kind: input, shape index: {}]   ;;  %s647_s6 = inlined_call_operand.hbm [shape: f32[16,128], index: 6, kind: output, shape index: {}]  }
   0x1   :  { %v426_v0 = vld [vmem:[%s643_s2 + $0x4] ss:$8 sps:$4 sm:$0xff]   ;;  %v428_v1 = vld [vmem:[%s643_s2] ss:$8 sps:$4 sm:$0xff]   ;;  %v429_v2 = vld [vmem:[%s643_s2 + $0x14] ss:$8 sps:$4 sm:$0xff]  }
   0x2   :  { %142 = vmatprep.subr.bf16.mxu0 %v426_v0  ;;  %v431_v3 = vld [vmem:[%s643_s2 + $0x10] ss:$8 sps:$4 sm:$0xff]   ;;  %v432_v4 = vld [vmem:[%s643_s2 + $0x24] ss:$8 sps:$4 sm:$0xff]   ;;  %v434_v16 = vld [vmem:[%s643_s2 + $0x20] ss:$8 sps:$4 sm:$0xff]  }
   0x3   :  { %143 = vmatpush1.bf16.xpose.msra.mxu0 %v428_v1  ;;  %v198_v5 = vld [vmem:[%s645_s4] sm:$0xff]  ;;  %v199_v6 = vld [vmem:[%s645_s4 + $0x8] sm:$0xff]  ;;  %v200_v7 = vld [vmem:[%s645_s4 + $0x10] sm:$0xff] }
   0x4   :  { %144 = vmatprep.subr.bf16.mxu0 %v429_v2  ;;  %v390_v8 = vpack.c.bf16 %v199_v6, %v198_v5  ;;  %v201_v9 = vld [vmem:[%s645_s4 + $0x18] sm:$0xff]  ;;  %v202_v11 = vld [vmem:[%s645_s4 + $0x20] sm:$0xff]  ;;  %v203_v12 = vld [vmem:[%s645_s4 + $0x28] sm:$0xff] }
   0x5   :  { %v394_v10 = vpack.c.bf16 %v201_v9, %v200_v7  ;;  %v398_v13 = vpack.c.bf16 %v203_v12, %v202_v11  ;;  %v204_v14 = vld [vmem:[%s645_s4 + $0x30] sm:$0xff]  ;;  %v205_v15 = vld [vmem:[%s645_s4 + $0x38] sm:$0xff]  ;;  %v452_v17 = vld [vmem:[%s642_s1 + $0x4] ss:$8 sps:$4 sm:$0xff]  }
   0x6   :  { %391 = vmatprep.subr.bf16.mxu1 %v390_v8  ;;  %v435_v18 = vld [vmem:[%s643_s2 + $0x34] ss:$8 sps:$4 sm:$0xff]   ;;  %v402_v19 = vpack.c.bf16 %v205_v15, %v204_v14  ;;  %174 = vmatprep.mubr.bf16.mxu0 %v452_v17  ;;  %v196_v20 = vld [vmem:[%s644_s3] sm:$0xff]  ;;  %v207_v22 = vld [vmem:[%s645_s4 + $0x48] sm:$0xff] }
   0x7   :  { %393 = vmatpush3.bf16.msra.mxu1 %v390_v8  ;;  %v206_v21 = vld [vmem:[%s645_s4 + $0x40] sm:$0xff]  ;;  %387 = vmatprep.mubr.f32.mxu1 %v196_v20 }
   0x8   :  { %395 = vmatprep.subr.bf16.mxu1 %v394_v10 }
   0xb   :  { %145 = vmatpush1.bf16.xpose.msra.mxu0 %v431_v3  ;;  %397 = vmatpush3.bf16.msra.mxu1 %v394_v10 }
   0xc   :  { %146 = vmatprep.subr.bf16.mxu0 %v432_v4  ;;  %399 = vmatprep.subr.bf16.mxu1 %v398_v13 }
   0xd   :  { %12 = vsyncpa [#allocation4], 0  ;;  %v406_v23 = vpack.c.bf16 %v207_v22, %v206_v21  ;;  %v208_v24 = vld [vmem:[%s645_s4 + $0x50] sm:$0xff]  ;;  %v209_v25 = vld [vmem:[%s645_s4 + $0x58] sm:$0xff]  ;;  %v193_v47 = vstv %s641_s0 }
   0xe   :  { %v437_v26 = vld [vmem:[%s643_s2 + $0x30] ss:$8 sps:$4 sm:$0xff]   ;;  %v438_v27 = vld [vmem:[%s643_s2 + $0x44] ss:$8 sps:$4 sm:$0xff]   ;;  %v410_v28 = vpack.c.bf16 %v209_v25, %v208_v24  ;;  %v440_v34 = vld [vmem:[%s643_s2 + $0x40] ss:$8 sps:$4 sm:$0xff]  }
   0xf   :  { %401 = vmatpush3.bf16.msra.mxu1 %v398_v13  ;;  %v210_v29 = vld [vmem:[%s645_s4 + $0x60] sm:$0xff]  ;;  %v211_v30 = vld [vmem:[%s645_s4 + $0x68] sm:$0xff]  ;;  %v212_v32 = vld [vmem:[%s645_s4 + $0x70] sm:$0xff] }
  0x10   :  { %403 = vmatprep.subr.bf16.mxu1 %v402_v19  ;;  %v414_v31 = vpack.c.bf16 %v211_v30, %v210_v29  ;;  %v213_v33 = vld [vmem:[%s645_s4 + $0x78] sm:$0xff]  ;;  %v444_v38 = vld [vmem:[%s643_s2 + $0x64] ss:$8 sps:$4 sm:$0xff]   ;;  %v446_v40 = vld [vmem:[%s643_s2 + $0x60] ss:$8 sps:$4 sm:$0xff]  }
  0x11   :  { %v441_v35 = vld [vmem:[%s643_s2 + $0x54] ss:$8 sps:$4 sm:$0xff]   ;;  %v418_v36 = vpack.c.bf16 %v213_v33, %v212_v32  ;;  %v443_v37 = vld [vmem:[%s643_s2 + $0x50] ss:$8 sps:$4 sm:$0xff]   ;;  %v197_v39 = vld [vmem:[%s644_s3 + $0x8] sm:$0xff] }
  0x12   :  { %v447_v41 = vld [vmem:[%s643_s2 + $0x74] ss:$8 sps:$4 sm:$0xff]   ;;  %v449_v42 = vld [vmem:[%s643_s2 + $0x70] ss:$8 sps:$4 sm:$0xff]   ;;  %v450_v43 = vld [vmem:[%s642_s1] ss:$8 sps:$4 sm:$0xff]  }
  0x13   :  { %147 = vmatpush1.bf16.xpose.msra.mxu0 %v434_v16  ;;  %405 = vmatpush3.bf16.msra.mxu1 %v402_v19  ;;  %v336_v52 = vld [vmem:[%s646_s5] ss:$0 sm:$0xff]  ;;  %s477_s2 = smov [#allocation3]  }
  0x14   :  { %148 = vmatprep.subr.bf16.mxu0 %v435_v18  ;;  %407 = vmatprep.subr.bf16.mxu1 %v406_v23  ;;  %s307_s1 = sshll.u32 %s477_s2, 4  ;;  %s308_s1 = int_to_ptr.vmem [resolvable:$true] %s307_s1 }
  0x15   :  { %s453_s23 = scalar_lea.vmem %s308_s1, 256  ;;  %p458_p1 = scmp.lt.s32.totalorder %s308_s1, %s308_s1 }
  0x16   :  { %p454_p0 = scmp.ne.s32.totalorder %s308_s1, %s453_s23  ;;  %p459_p2 = scmp.lt.s32.totalorder %s453_s23, %s453_s23 }
  0x17   :  { %409 = vmatpush3.bf16.msra.mxu1 %v406_v23 }
  0x18   :  { %411 = vmatprep.subr.bf16.mxu1 %v410_v28  ;;  %p460_p3 = por %p459_p2, %p458_p1 }
  0x1a   :  { %p461_p4 = pnand %p460_p3, %p454_p0 }
  0x1b   :  { %149 = vmatpush1.bf16.xpose.msra.mxu0 %v437_v26  ;;  %413 = vmatpush3.bf16.msra.mxu1 %v410_v28 }
  0x1c   :  { %150 = vmatprep.subr.bf16.mxu0 %v438_v27  ;;  %415 = vmatprep.subr.bf16.mxu1 %v414_v31 }
  0x1f   :  { %417 = vmatpush3.bf16.msra.mxu1 %v414_v31 }
  0x20   :  { %419 = vmatprep.subr.bf16.mxu1 %v418_v36 }
  0x23   :  { %151 = vmatpush1.bf16.xpose.msra.mxu0 %v440_v34  ;;  %421 = vmatpush3.bf16.msra.mxu1 %v418_v36 }
  0x24   :  { %152 = vmatprep.subr.bf16.mxu0 %v441_v35 }
  0x26   :  { %388 = vmatmul.mubr.f32.vlgmr.msra.gmra.mrb[0].mxu1 %v197_v39 }
  0x2b   :  { %153 = vmatpush1.bf16.xpose.msra.mxu0 %v443_v37 }
  0x2c   :  { %154 = vmatprep.subr.bf16.mxu0 %v444_v38 }
  0x33   :  { %155 = vmatpush1.bf16.xpose.msra.mxu0 %v446_v40 }
  0x34   :  { %156 = vmatprep.subr.bf16.mxu0 %v447_v41 }
  0x3b   :  { %157 = vmatpush1.bf16.xpose.msra.mxu0 %v449_v42 }
  0x42   :  { %175 = vmatmul.mubr.bf16.vlgmr.msra.gmra.mrb[0].mxu0 %v450_v43 }
  0xf9   :  { %v389_v44 = vpop.f32.mrb[0].mxu1 }
  0xfa   :  { %v280_v45 = vpop.f32.mrb[1].mxu1 }
 0x115   :  { %v176_v46 = vpop.f32.mrb[0].mxu0 }
 0x116   :  { %v178_v48 = vpop.f32.mrb[1].mxu0  ;;  %v194_v51 = vmul.f32 %v193_v47, %v176_v46 }
 0x117   :  { %v179_v49 = vpop.f32.mrb[2].mxu0 }
 0x118   :  { %v181_v50 = vpop.f32.mrb[3].mxu0  ;;  %v195_v53 = vmul.f32 %v193_v47, %v179_v49  ;;  %v289_v54 = vadd.f32 %v280_v45, %v194_v51 }
 0x11a   :  { %v290_v55 = vadd.f32 %v389_v44, %v195_v53  ;;  %v298_v56 = vadd.f32 %v336_v52, %v289_v54 }
 0x11c   :  { %v299_v57 = vadd.f32 %v336_v52, %v290_v55  ;;  %300 = vst [vmem:[#allocation3] sm:$0xff] %v298_v56 }
 0x11e   :  { %301 = vst [vmem:[#allocation3 + $0x8] sm:$0xff] %v299_v57 }
 0x11f   :  { %464 = shalt.err (!%p461_p4)
}
 0x120   :  { %s465_s5 = scalar_lea.hbm %s647_s6, 256 }
 0x121   :  { %p466_p5 = scmp.ne.s32.totalorder %s647_s6, %s465_s5  ;;  %p469_p6 = scmp.lt.u32.totalorder %s465_s5, %s647_s6 }
 0x123   :  { %p471_p7 = pnand %p469_p6, %p466_p5 }
 0x125   :  { %474 = shalt.err (!%p471_p7)
}
 0x126   :  { %s478_s29 = smov 128   ;;  %s479_s30 = smov 8  }
 0x127   :  { %313 = dma.vmem_to_hbm [thread:$0]  %s308_s1, 256, %s647_s6, [#allocation4], %s478_s29, %s478_s29, %s479_s30  }
 0x128   :  { %475 = dma.done.wait [#allocation4], 256  }
 0x129   :  { %476 = vsyncadd [#allocation4], 4294967040 }
 0x12a   :  { %317 = vsyncpa [#allocation4], 1 }

</bundles_post_ra>
